<compile_context>
chip_gen: v6e
topology: v6e:2x2x1
jax: 0.10.0
libtpu: 0.0.40
codegen_flags: <defaults>
</compile_context>

<pallas_src>
import functools

import jax
import jax.numpy as jnp
from jax.experimental import pallas as pl
from jax.experimental.pallas import tpu as pltpu


def _mac_kernel(x_ref, o_ref, acc_ref, *, s_total, s_tile, needs_mask):
    # x_ref:   (R_tile, S_tile) input block
    # o_ref:   (R_tile, 1) per-row max output (same block across spatial axis)
    # acc_ref: (R_tile, S_tile) VMEM scratch accumulator
    s = pl.program_id(1)

    @pl.when(s == 0)
    def _():
        acc_ref[...] = jnp.full_like(acc_ref, -jnp.inf)

    blk = x_ref[...]
    if needs_mask:
        # Mask columns of the (possibly partial) tail block with -inf.
        col = jax.lax.broadcasted_iota(jnp.int32, blk.shape, 1) + s * s_tile
        blk = jnp.where(col < s_total, blk, jnp.array(-jnp.inf, blk.dtype))

    acc_ref[...] = jnp.maximum(acc_ref[...], blk)

    @pl.when(s == pl.num_programs(1) - 1)
    def _():
        o_ref[...] = jnp.max(acc_ref[...], axis=1, keepdims=True).astype(o_ref.dtype)


def mac_pool(x_nchw: jax.Array, *, row_tile: int = 256, spatial_tile: int = 2048) -> jax.Array:
    """Global max pool.  x_nchw: [B, C, H, W] -> [B, C]."""
    B, C, H, W = x_nchw.shape
    S = H * W
    R = B * C

    # Free reshape of the contiguous NCHW buffer (no transpose / no data move).
    x2d = x_nchw.reshape(R, S)

    # Row tile: multiple of 8 (sublane) or the full extent.
    r_tile = R if R <= row_tile else row_tile
    # Spatial tile: multiple of 128 (lane) or the full extent.
    s_tile = S if S <= spatial_tile else spatial_tile
    needs_mask = (S % s_tile) != 0

    grid = (pl.cdiv(R, r_tile), pl.cdiv(S, s_tile))

    kernel = functools.partial(
        _mac_kernel, s_total=S, s_tile=s_tile, needs_mask=needs_mask
    )

    out = pl.pallas_call(
        kernel,
        out_shape=jax.ShapeDtypeStruct((R, 1), x2d.dtype),
        grid_spec=pltpu.PrefetchScalarGridSpec(
            num_scalar_prefetch=0,
            grid=grid,
            in_specs=[pl.BlockSpec((r_tile, s_tile), lambda r, s: (r, s))],
            out_specs=pl.BlockSpec((r_tile, 1), lambda r, s: (r, 0)),
            scratch_shapes=[pltpu.VMEM((r_tile, s_tile), x2d.dtype)],
        ),
        compiler_params=pltpu.CompilerParams(
            # Row axis independent (sharded across TCs on v7x); spatial axis is
            # the reduction -> last + arbitrary.
            dimension_semantics=("parallel", "arbitrary"),
        ),
    )(x2d)
    return out.reshape(B, C)


if __name__ == "__main__":
    key = jax.random.PRNGKey(0)

    # Primary small test shape (matches the module spec).
    B, C, H, W = 2, 4, 16, 16
    x = jax.random.normal(key, (B, C, H, W), dtype=jnp.float32)
    out = jax.block_until_ready(mac_pool(x))
    ref = jnp.max(x, axis=(2, 3))
    assert out.shape == (B, C)
    assert jnp.allclose(out, ref, atol=1e-6, rtol=1e-6)

    # Ragged spatial extent (S = 169 with a 128-wide spatial tile) exercises
    # the cdiv grid + -inf tail masking path.
    k2 = jax.random.PRNGKey(1)
    x2 = jax.random.normal(k2, (2, 3, 13, 13), dtype=jnp.float32)
    out2 = jax.block_until_ready(mac_pool(x2, spatial_tile=128))
    ref2 = jnp.max(x2, axis=(2, 3))
    assert jnp.allclose(out2, ref2, atol=1e-6, rtol=1e-6)

    # Multiple row blocks exercises the "parallel" row grid axis.
    k3 = jax.random.PRNGKey(2)
    x3 = jax.random.normal(k3, (2, 64, 16, 16), dtype=jnp.float32)
    out3 = jax.block_until_ready(mac_pool(x3, row_tile=64))
    ref3 = jnp.max(x3, axis=(2, 3))
    assert jnp.allclose(out3, ref3, atol=1e-6, rtol=1e-6)

    print("KERNEL_OK")
</pallas_src>

<mosaic_0001>
module attributes {stable_mosaic.version = 11 : i64} {
  func.func @_mac_kernel(%arg0: i32, %arg1: i32, %arg2: memref<8x256xf32, #tpu.memory_space<vmem>>, %arg3: memref<8x1xf32, #tpu.memory_space<vmem>>, %arg4: memref<8x256xf32, #tpu.memory_space<vmem>>) attributes {dimension_semantics = [#tpu.dimension_semantics<parallel>, #tpu.dimension_semantics<arbitrary>], iteration_bounds = array<i64: 1, 1>, scalar_prefetch = 0 : i64, scratch_operands = 1 : i64, tpu.core_type = #tpu.core_type<tc>, window_params = [{transform_indices = @transform_0, window_bounds = array<i64: 8, 256>}, {transform_indices = @transform_1, window_bounds = array<i64: 8, 1>}]} {
    %c0_i32 = arith.constant 0 : i32
    %0 = arith.cmpi eq, %arg1, %c0_i32 : i32
    %1 = arith.extui %0 : i1 to i32
    %c0_i32_0 = arith.constant 0 : i32
    %2 = arith.cmpi ne, %1, %c0_i32_0 : i32
    scf.if %2 {
      %cst = arith.constant 0xFF800000 : f32
      %10 = vector.broadcast %cst : f32 to vector<8x256xf32>
      %c0_8 = arith.constant 0 : index
      %c0_9 = arith.constant 0 : index
      %11 = vector.load %arg4[%c0_8, %c0_9] : memref<8x256xf32, #tpu.memory_space<vmem>>, vector<8x256xf32>
      tpu.vector_store %arg4[%c0_8, %c0_9], %10 {strides = array<i32>} : memref<8x256xf32, #tpu.memory_space<vmem>>, vector<8x256xf32>,
    } else {
    }
    %c0 = arith.constant 0 : index
    %c0_1 = arith.constant 0 : index
    %3 = vector.load %arg2[%c0, %c0_1] : memref<8x256xf32, #tpu.memory_space<vmem>>, vector<8x256xf32>
    %c0_2 = arith.constant 0 : index
    %c0_3 = arith.constant 0 : index
    %4 = vector.load %arg4[%c0_2, %c0_3] : memref<8x256xf32, #tpu.memory_space<vmem>>, vector<8x256xf32>
    %5 = arith.maximumf %4, %3 : vector<8x256xf32>
    %c0_4 = arith.constant 0 : index
    %c0_5 = arith.constant 0 : index
    %6 = vector.load %arg4[%c0_4, %c0_5] : memref<8x256xf32, #tpu.memory_space<vmem>>, vector<8x256xf32>
    tpu.vector_store %arg4[%c0_4, %c0_5], %5 {strides = array<i32>} : memref<8x256xf32, #tpu.memory_space<vmem>>, vector<8x256xf32>,
    %c0_i32_6 = arith.constant 0 : i32
    %7 = arith.cmpi eq, %arg1, %c0_i32_6 : i32
    %8 = arith.extui %7 : i1 to i32
    %c0_i32_7 = arith.constant 0 : i32
    %9 = arith.cmpi ne, %8, %c0_i32_7 : i32
    scf.if %9 {
      %c0_8 = arith.constant 0 : index
      %c0_9 = arith.constant 0 : index
      %10 = vector.load %arg4[%c0_8, %c0_9] : memref<8x256xf32, #tpu.memory_space<vmem>>, vector<8x256xf32>
      %cst = arith.constant dense<0xFF800000> : vector<8xf32>
      %11 = vector.multi_reduction <maximumf>, %10, %cst [1] : vector<8x256xf32> to vector<8xf32>
      %12 = vector.shape_cast %11 : vector<8xf32> to vector<8x1xf32>
      %c0_10 = arith.constant 0 : index
      %c0_11 = arith.constant 0 : index
      %13 = vector.load %arg3[%c0_10, %c0_11] : memref<8x1xf32, #tpu.memory_space<vmem>>, vector<8x1xf32>
      tpu.vector_store %arg3[%c0_10, %c0_11], %12 {strides = array<i32>} : memref<8x1xf32, #tpu.memory_space<vmem>>, vector<8x1xf32>,
    } else {
    }
    return
  }
  func.func @transform_0(%arg0: i32, %arg1: i32) -> (i32, i32) {
    %c0_i32 = arith.constant 0 : i32
    return %arg0, %arg1 : i32, i32
  }
  func.func @transform_1(%arg0: i32, %arg1: i32) -> (i32, i32) {
    %c0_i32 = arith.constant 0 : i32
    %c0_i32_0 = arith.constant 0 : i32
    return %arg0, %c0_i32 : i32, i32
  }
}

</mosaic_0001>

<bundles_post_ra>
// kernel: tpu_custom_call.1
= control target key start
LH: loop header
LB: loop body
LE: loop exit
PB: predicated region body
PF: predicated region fallthrough
CT: control target
= control target key end

     0   :  { %6 = vsyncpa [#allocation4], 0  ;;  %s72_s6 = smov [#allocation3]   ;;  %s89_s0 = inlined_call_operand.hbm [shape: f32[8,256], index: 0, kind: input, shape index: {}]   ;;  %s90_s1 = inlined_call_operand.vmem [shape: f32[8,1], index: 1, kind: output, shape index: {}]  }
   0x1   :  { %s13_s7 = sshll.u32 %s72_s6, 4  ;;  %s14_s7 = int_to_ptr.vmem [resolvable:$true] %s13_s7 }
   0x2   :  { %s58_s8 = scalar_lea.vmem %s14_s7, 256  ;;  %p63_p1 = scmp.lt.s32.totalorder %s14_s7, %s14_s7 }
   0x3   :  { %p59_p0 = scmp.ne.s32.totalorder %s14_s7, %s58_s8  ;;  %p64_p2 = scmp.lt.s32.totalorder %s58_s8, %s58_s8 }
   0x5   :  { %p65_p3 = por %p64_p2, %p63_p1 }
   0x7   :  { %p66_p4 = pnand %p65_p3, %p59_p0 }
   0x9   :  { %69 = shalt.err (!%p66_p4)
}
   0xa   :  { %16 = dma.hbm_to_vmem [thread:$0]  %s89_s0, 256, %s14_s7, [#allocation4]  }
   0xb   :  { %70 = dma.done.wait [#allocation4], 256  }
   0xc   :  { %71 = vsyncadd [#allocation4], 4294967040  ;;  %v26_v0 = vld [vmem:[#allocation3] sm:$0xff]  ;;  %v27_v1 = vld [vmem:[#allocation3 + $0x8] sm:$0xff]  ;;  %vm42_vm0 = vcmask 7168  }
   0xd   :  { %v39_v2 = vmax.f32 %v26_v0, %v27_v1 }
   0xf   :  { %40 = vmax.xlane.f32.xlu0 %v39_v2 }
  0x98   :  { %v41_v3 = vpop.xlane.xlu0 %40 }
  0x99   :  { %43 = vst.msk [vmem:[%s90_s1] sm:$0xff] %vm42_vm0, %v41_v3 }
  0x9a   :  { %48 = vsyncpa [#allocation4], 1 }

</bundles_post_ra>
